<compile_context>
chip_gen: v7x
topology: tpu7x:2x2x1
jax: 0.10.0
libtpu: 0.0.40
codegen_flags: <defaults>
</compile_context>

<pallas_src>
import functools

import jax
import jax.numpy as jnp
from jax.experimental import pallas as pl
from jax.experimental.pallas import tpu as pltpu

_LANES = 128               # all conv channel dims are zero-padded to this
_MAX_ROWS_PER_STEP = 512   # cap on b_tile * L per grid step (VMEM-safe on v7x)


def fcn_fused_kernel(x_ref, w0_ref, t0_ref,
                     w1_ref, t1_ref,
                     w2_ref, t2_ref,
                     fcw_ref, fcb_ref, o_ref,
                     h1p_ref, h2p_ref, *, use_bf16):
    """One batch tile of the whole network; all activations stay in VMEM.

    x_ref   : (B, L, 14)        layer-0 im2col of the 2-channel input
    w*_ref  : (K*Cin_pad, 128)  im2col conv weights with BN scale pre-folded
    t*_ref  : (1, 128)          folded BatchNorm shift (beta - mean*scale)
    fcw/fcb : (128, 2) / (1, 2) final Linear (rows >= 64 are zero padding)
    o_ref   : (1, B, 2)
    h1p/h2p : zero-halo VMEM scratch for the K=5 / K=3 convolutions
    """
    B, L, kc0 = x_ref.shape

    def mxu(lhs, w):
        if use_bf16:  # bf16 operands, f32 accumulation (v5e/v6e/v7x option)
            lhs = lhs.astype(jnp.bfloat16)
            w = w.astype(jnp.bfloat16)
        return jnp.dot(lhs, w, preferred_element_type=jnp.float32)

    # ---- conv0 (K=7, Cin=2) * BN-scale folded, + shift + ReLU --------------
    a0 = mxu(x_ref[...].reshape(B * L, kc0), w0_ref[...])
    h0 = jnp.maximum(a0 + t0_ref[...], 0.0)                         # (B*L, 128)

    # ---- conv1 (K=5) + shift + ReLU: zero-halo scratch -> im2col matmul ----
    p1 = 2
    h1p_ref[:, :p1, :] = jnp.zeros((B, p1, _LANES), jnp.float32)
    h1p_ref[:, p1 + L:, :] = jnp.zeros((B, p1, _LANES), jnp.float32)
    h1p_ref[:, p1:p1 + L, :] = h0.reshape(B, L, _LANES)
    cols1 = jnp.concatenate([h1p_ref[:, k:k + L, :] for k in range(5)], axis=-1)
    a1 = mxu(cols1.reshape(B * L, 5 * _LANES), w1_ref[...])
    h1 = jnp.maximum(a1 + t1_ref[...], 0.0)                         # (B*L, 128)

    # ---- conv2 (K=3) + shift + ReLU ----------------------------------------
    p2 = 1
    h2p_ref[:, :p2, :] = jnp.zeros((B, p2, _LANES), jnp.float32)
    h2p_ref[:, p2 + L:, :] = jnp.zeros((B, p2, _LANES), jnp.float32)
    h2p_ref[:, p2:p2 + L, :] = h1.reshape(B, L, _LANES)
    cols2 = jnp.concatenate([h2p_ref[:, k:k + L, :] for k in range(3)], axis=-1)
    a2 = mxu(cols2.reshape(B * L, 3 * _LANES), w2_ref[...])
    h2 = jnp.maximum(a2 + t2_ref[...], 0.0)                         # (B*L, 128)

    # ---- AdaptiveAvgPool1d(1) + Flatten + Linear(64, 2), fused epilogue ----
    pooled = jnp.mean(h2.reshape(B, L, _LANES), axis=1)             # (B, 128)
    out = jnp.dot(pooled, fcw_ref[...], preferred_element_type=jnp.float32)
    o_ref[0] = (out + fcb_ref[...]).astype(o_ref.dtype)


def _pack_conv(w, scale, shift, cin_pad):
    """(K, Cin, Cout) conv weight -> lane-dense im2col layout (K*cin_pad, 128).

    The BatchNorm scale is folded directly into the conv weights (conv is
    linear), so only the shift needs to be applied inside the kernel.
    """
    K, cin, cout = w.shape
    w = w * scale[None, None, :]
    w = jnp.pad(w, ((0, 0), (0, cin_pad - cin), (0, _LANES - cout)))
    shift = jnp.pad(shift, (0, _LANES - cout)).reshape(1, _LANES)
    return w.reshape(K * cin_pad, _LANES), shift


def fcn_forward(params, x_ncl, *, b_tile=None, use_bf16=False):
    """x_ncl: (N, 2, L) PyTorch NCW input -> (N, 2) logits."""
    N, cin, L = x_ncl.shape
    x = jnp.transpose(x_ncl, (0, 2, 1)).astype(jnp.float32)          # (N, L, 2)

    # Layer-0 im2col built in the wrapper: the raw input has only 2 channels,
    # so this (N, L, 14) slab is tiny compared with any activation tensor.
    K0 = params["conv0"][0].shape[0]
    pad0 = K0 // 2
    xp = jnp.pad(x, ((0, 0), (pad0, pad0), (0, 0)))
    x_cols = jnp.concatenate([xp[:, k:k + L, :] for k in range(K0)], axis=-1)

    # Batch tiling: flatten b_tile*L rows into the MXU M dimension per step,
    # capped for VMEM, while keeping >=2 grid steps when N >= 2 so both v7x
    # TensorCores get a shard of the "parallel" axis.
    if b_tile is None:
        b_tile = max(1, min(N, _MAX_ROWS_PER_STEP // max(L, 1))) if L % 8 == 0 else 1
        if N >= 2:
            b_tile = min(b_tile, pl.cdiv(N, 2))
    b_tile = max(1, min(b_tile, N))
    num_tiles = pl.cdiv(N, b_tile)
    n_pad = num_tiles * b_tile
    if n_pad != N:
        x_cols = jnp.concatenate(
            [x_cols, jnp.zeros((n_pad - N,) + x_cols.shape[1:], x_cols.dtype)], axis=0)

    # Pack weights (tiny): fold BN scale, zero-pad channels to 128 lanes,
    # im2col 2-D layout.
    w0, t0 = _pack_conv(*params["conv0"], cin_pad=cin)
    w1, t1 = _pack_conv(*params["conv1"], cin_pad=_LANES)
    w2, t2 = _pack_conv(*params["conv2"], cin_pad=_LANES)
    fc_w = jnp.pad(params["fc_w"], ((0, _LANES - params["fc_w"].shape[0]), (0, 0)))
    fc_b = params["fc_b"].reshape(1, -1)
    consts = [w0, t0, w1, t1, w2, t2, fc_w, fc_b]

    kc0 = x_cols.shape[-1]
    out = pl.pallas_call(
        functools.partial(fcn_fused_kernel, use_bf16=use_bf16),
        out_shape=jax.ShapeDtypeStruct((num_tiles, b_tile, 2), jnp.float32),
        grid=(num_tiles,),
        in_specs=[pl.BlockSpec((b_tile, L, kc0), lambda n: (n, 0, 0))]
        + [pl.BlockSpec(a.shape, lambda n, nd=a.ndim: (0,) * nd) for a in consts],
        out_specs=pl.BlockSpec((1, b_tile, 2), lambda n: (n, 0, 0)),
        scratch_shapes=[
            pltpu.VMEM((b_tile, L + 4, _LANES), jnp.float32),   # conv1 halo
            pltpu.VMEM((b_tile, L + 2, _LANES), jnp.float32),   # conv2 halo
        ],
        compiler_params=pltpu.CompilerParams(dimension_semantics=("parallel",)),
    )(x_cols, *consts)
    return out.reshape(n_pad, 2)[:N]


# ---------------------------------------------------------------------------
# Deterministic parameter init + pure-JAX reference (identical math).
# ---------------------------------------------------------------------------
def init_params(key):
    keys = jax.random.split(key, 11)
    params = {}
    specs = [(7, 2, 64), (5, 64, 128), (3, 128, 64)]
    for i, (K, cin, cout) in enumerate(specs):
        fan_in = float(cin * K)
        w = jax.random.normal(keys[3 * i], (K, cin, cout), jnp.float32) / jnp.sqrt(fan_in)
        gamma = 1.0 + 0.1 * jax.random.normal(keys[3 * i + 1], (cout,), jnp.float32)
        beta = 0.1 * jax.random.normal(keys[3 * i + 2], (cout,), jnp.float32)
        running_mean = jnp.zeros((cout,), jnp.float32)
        running_var = jnp.ones((cout,), jnp.float32)
        scale = gamma / jnp.sqrt(running_var + 1e-5)
        shift = beta - running_mean * scale
        params[f"conv{i}"] = (w, scale, shift)
    params["fc_w"] = jax.random.normal(keys[9], (64, 2), jnp.float32) / jnp.sqrt(64.0)
    params["fc_b"] = 0.01 * jax.random.normal(keys[10], (2,), jnp.float32)
    return params


def fcn_reference(params, x_ncl):
    x = jnp.transpose(x_ncl, (0, 2, 1)).astype(jnp.float32)
    N, L, _ = x.shape
    for i in range(3):
        w, scale, shift = params[f"conv{i}"]
        K, cin, cout = w.shape
        pad = K // 2
        xp = jnp.pad(x, ((0, 0), (pad, pad), (0, 0)))
        cols = jnp.concatenate([xp[:, k:k + L, :] for k in range(K)], axis=-1)
        acc = cols.reshape(N * L, K * cin) @ w.reshape(K * cin, cout)
        x = jnp.maximum(acc.reshape(N, L, cout) * scale + shift, 0.0)
    pooled = jnp.mean(x, axis=1)
    return pooled @ params["fc_w"] + params["fc_b"]


if __name__ == "__main__":
    key = jax.random.PRNGKey(0)
    pkey, xkey = jax.random.split(key)
    params = init_params(pkey)

    N, C_in, L = 2, 2, 16
    x = jax.random.normal(xkey, (N, C_in, L), jnp.float32)

    out = jax.block_until_ready(fcn_forward(params, x))
    ref = fcn_reference(params, x)

    assert out.shape == (N, 2), out.shape
    assert jnp.allclose(out, ref, atol=2e-4, rtol=2e-4), (out, ref)
    print("KERNEL_OK")
</pallas_src>

<mosaic_0001>
module attributes {stable_mosaic.version = 11 : i64} {
  func.func @fcn_fused_kernel(%arg0: i32, %arg1: memref<1x16x14xf32, #tpu.memory_space<vmem>>, %arg2: memref<14x128xf32, #tpu.memory_space<vmem>>, %arg3: memref<1x128xf32, #tpu.memory_space<vmem>>, %arg4: memref<640x128xf32, #tpu.memory_space<vmem>>, %arg5: memref<1x128xf32, #tpu.memory_space<vmem>>, %arg6: memref<384x128xf32, #tpu.memory_space<vmem>>, %arg7: memref<1x128xf32, #tpu.memory_space<vmem>>, %arg8: memref<128x2xf32, #tpu.memory_space<vmem>>, %arg9: memref<1x2xf32, #tpu.memory_space<vmem>>, %arg10: memref<1x1x2xf32, #tpu.memory_space<vmem>>, %arg11: memref<1x20x128xf32, #tpu.memory_space<vmem>>, %arg12: memref<1x18x128xf32, #tpu.memory_space<vmem>>) attributes {dimension_semantics = [#tpu.dimension_semantics<parallel>], iteration_bounds = array<i64: 2>, scalar_prefetch = 0 : i64, scratch_operands = 2 : i64, tpu.core_type = #tpu.core_type<tc>, window_params = [{transform_indices = @transform_0, window_bounds = array<i64: 1, 16, 14>}, {pipeline_mode = #tpu.pipeline_mode<synchronous>, transform_indices = @transform_1, window_bounds = array<i64: 14, 128>}, {pipeline_mode = #tpu.pipeline_mode<synchronous>, transform_indices = @transform_2, window_bounds = array<i64: 1, 128>}, {pipeline_mode = #tpu.pipeline_mode<synchronous>, transform_indices = @transform_3, window_bounds = array<i64: 640, 128>}, {pipeline_mode = #tpu.pipeline_mode<synchronous>, transform_indices = @transform_4, window_bounds = array<i64: 1, 128>}, {pipeline_mode = #tpu.pipeline_mode<synchronous>, transform_indices = @transform_5, window_bounds = array<i64: 384, 128>}, {pipeline_mode = #tpu.pipeline_mode<synchronous>, transform_indices = @transform_6, window_bounds = array<i64: 1, 128>}, {pipeline_mode = #tpu.pipeline_mode<synchronous>, transform_indices = @transform_7, window_bounds = array<i64: 128, 2>}, {pipeline_mode = #tpu.pipeline_mode<synchronous>, transform_indices = @transform_8, window_bounds = array<i64: 1, 2>}, {transform_indices = @transform_9, window_bounds = array<i64: 1, 1, 2>}]} {
    %c0 = arith.constant 0 : index
    %c0_0 = arith.constant 0 : index
    %c0_1 = arith.constant 0 : index
    %0 = vector.load %arg1[%c0, %c0_0, %c0_1] : memref<1x16x14xf32, #tpu.memory_space<vmem>>, vector<1x16x14xf32>
    %1 = vector.shape_cast %0 : vector<1x16x14xf32> to vector<16x14xf32>
    %c0_2 = arith.constant 0 : index
    %c0_3 = arith.constant 0 : index
    %2 = vector.load %arg2[%c0_2, %c0_3] : memref<14x128xf32, #tpu.memory_space<vmem>>, vector<14x128xf32>
    %cst = arith.constant dense<0.000000e+00> : vector<16x128xf32>
    %3 = tpu.matmul %1, %2, %cst {dimension_numbers = #tpu.dot_dimension_numbers<[1], [0], [0], [1], [0, 0, 1, 1], [], []>} : vector<16x14xf32>, vector<14x128xf32>, vector<16x128xf32> -> vector<16x128xf32>
    %c0_4 = arith.constant 0 : index
    %c0_5 = arith.constant 0 : index
    %4 = vector.load %arg3[%c0_4, %c0_5] : memref<1x128xf32, #tpu.memory_space<vmem>>, vector<1x128xf32>
    %5 = vector.broadcast %4 : vector<1x128xf32> to vector<16x128xf32>
    %6 = arith.addf %3, %5 : vector<16x128xf32>
    %cst_6 = arith.constant 0.000000e+00 : f32
    %7 = vector.broadcast %cst_6 : f32 to vector<16x128xf32>
    %8 = arith.maximumf %6, %7 : vector<16x128xf32>
    %cst_7 = arith.constant 0.000000e+00 : f32
    %9 = vector.broadcast %cst_7 : f32 to vector<1x2x128xf32>
    %c0_8 = arith.constant 0 : index
    %c0_9 = arith.constant 0 : index
    %c0_10 = arith.constant 0 : index
    %10 = vector.load %arg11[%c0_8, %c0_9, %c0_10] : memref<1x20x128xf32, #tpu.memory_space<vmem>>, vector<1x2x128xf32>
    tpu.vector_store %arg11[%c0_8, %c0_9, %c0_10], %9 {strides = array<i32>} : memref<1x20x128xf32, #tpu.memory_space<vmem>>, vector<1x2x128xf32>,
    %cst_11 = arith.constant 0.000000e+00 : f32
    %11 = vector.broadcast %cst_11 : f32 to vector<1x2x128xf32>
    %c0_12 = arith.constant 0 : index
    %c18 = arith.constant 18 : index
    %c0_13 = arith.constant 0 : index
    %12 = vector.load %arg11[%c0_12, %c18, %c0_13] : memref<1x20x128xf32, #tpu.memory_space<vmem>>, vector<1x2x128xf32>
    tpu.vector_store %arg11[%c0_12, %c18, %c0_13], %11 {strides = array<i32>} : memref<1x20x128xf32, #tpu.memory_space<vmem>>, vector<1x2x128xf32>,
    %13 = vector.shape_cast %8 : vector<16x128xf32> to vector<1x16x128xf32>
    %c0_14 = arith.constant 0 : index
    %c2 = arith.constant 2 : index
    %c0_15 = arith.constant 0 : index
    %14 = vector.load %arg11[%c0_14, %c2, %c0_15] : memref<1x20x128xf32, #tpu.memory_space<vmem>>, vector<1x16x128xf32>
    tpu.vector_store %arg11[%c0_14, %c2, %c0_15], %13 {strides = array<i32>} : memref<1x20x128xf32, #tpu.memory_space<vmem>>, vector<1x16x128xf32>,
    %c0_16 = arith.constant 0 : index
    %c0_17 = arith.constant 0 : index
    %c0_18 = arith.constant 0 : index
    %15 = vector.load %arg11[%c0_16, %c0_17, %c0_18] : memref<1x20x128xf32, #tpu.memory_space<vmem>>, vector<1x16x128xf32>
    %c0_19 = arith.constant 0 : index
    %c1 = arith.constant 1 : index
    %c0_20 = arith.constant 0 : index
    %16 = vector.load %arg11[%c0_19, %c1, %c0_20] : memref<1x20x128xf32, #tpu.memory_space<vmem>>, vector<1x16x128xf32>
    %c0_21 = arith.constant 0 : index
    %c2_22 = arith.constant 2 : index
    %c0_23 = arith.constant 0 : index
    %17 = vector.load %arg11[%c0_21, %c2_22, %c0_23] : memref<1x20x128xf32, #tpu.memory_space<vmem>>, vector<1x16x128xf32>
    %c0_24 = arith.constant 0 : index
    %c3 = arith.constant 3 : index
    %c0_25 = arith.constant 0 : index
    %18 = vector.load %arg11[%c0_24, %c3, %c0_25] : memref<1x20x128xf32, #tpu.memory_space<vmem>>, vector<1x16x128xf32>
    %c0_26 = arith.constant 0 : index
    %c4 = arith.constant 4 : index
    %c0_27 = arith.constant 0 : index
    %19 = vector.load %arg11[%c0_26, %c4, %c0_27] : memref<1x20x128xf32, #tpu.memory_space<vmem>>, vector<1x16x128xf32>
    %20 = tpu.concatenate %15, %16, %17, %18, %19 in 2 : vector<1x16x128xf32>, vector<1x16x128xf32>, vector<1x16x128xf32>, vector<1x16x128xf32>, vector<1x16x128xf32> -> vector<1x16x640xf32>
    %21 = vector.shape_cast %20 : vector<1x16x640xf32> to vector<16x640xf32>
    %c0_28 = arith.constant 0 : index
    %c0_29 = arith.constant 0 : index
    %22 = vector.load %arg4[%c0_28, %c0_29] : memref<640x128xf32, #tpu.memory_space<vmem>>, vector<640x128xf32>
    %cst_30 = arith.constant dense<0.000000e+00> : vector<16x128xf32>
    %23 = tpu.matmul %21, %22, %cst_30 {dimension_numbers = #tpu.dot_dimension_numbers<[1], [0], [0], [1], [0, 0, 1, 1], [], []>} : vector<16x640xf32>, vector<640x128xf32>, vector<16x128xf32> -> vector<16x128xf32>
    %c0_31 = arith.constant 0 : index
    %c0_32 = arith.constant 0 : index
    %24 = vector.load %arg5[%c0_31, %c0_32] : memref<1x128xf32, #tpu.memory_space<vmem>>, vector<1x128xf32>
    %25 = vector.broadcast %24 : vector<1x128xf32> to vector<16x128xf32>
    %26 = arith.addf %23, %25 : vector<16x128xf32>
    %cst_33 = arith.constant 0.000000e+00 : f32
    %27 = vector.broadcast %cst_33 : f32 to vector<16x128xf32>
    %28 = arith.maximumf %26, %27 : vector<16x128xf32>
    %cst_34 = arith.constant 0.000000e+00 : f32
    %29 = vector.broadcast %cst_34 : f32 to vector<1x1x128xf32>
    %c0_35 = arith.constant 0 : index
    %c0_36 = arith.constant 0 : index
    %c0_37 = arith.constant 0 : index
    %30 = vector.load %arg12[%c0_35, %c0_36, %c0_37] : memref<1x18x128xf32, #tpu.memory_space<vmem>>, vector<1x1x128xf32>
    tpu.vector_store %arg12[%c0_35, %c0_36, %c0_37], %29 {strides = array<i32>} : memref<1x18x128xf32, #tpu.memory_space<vmem>>, vector<1x1x128xf32>,
    %cst_38 = arith.constant 0.000000e+00 : f32
    %31 = vector.broadcast %cst_38 : f32 to vector<1x1x128xf32>
    %c0_39 = arith.constant 0 : index
    %c17 = arith.constant 17 : index
    %c0_40 = arith.constant 0 : index
    %32 = vector.load %arg12[%c0_39, %c17, %c0_40] : memref<1x18x128xf32, #tpu.memory_space<vmem>>, vector<1x1x128xf32>
    tpu.vector_store %arg12[%c0_39, %c17, %c0_40], %31 {strides = array<i32>} : memref<1x18x128xf32, #tpu.memory_space<vmem>>, vector<1x1x128xf32>,
    %33 = vector.shape_cast %28 : vector<16x128xf32> to vector<1x16x128xf32>
    %c0_41 = arith.constant 0 : index
    %c1_42 = arith.constant 1 : index
    %c0_43 = arith.constant 0 : index
    %34 = vector.load %arg12[%c0_41, %c1_42, %c0_43] : memref<1x18x128xf32, #tpu.memory_space<vmem>>, vector<1x16x128xf32>
    tpu.vector_store %arg12[%c0_41, %c1_42, %c0_43], %33 {strides = array<i32>} : memref<1x18x128xf32, #tpu.memory_space<vmem>>, vector<1x16x128xf32>,
    %c0_44 = arith.constant 0 : index
    %c0_45 = arith.constant 0 : index
    %c0_46 = arith.constant 0 : index
    %35 = vector.load %arg12[%c0_44, %c0_45, %c0_46] : memref<1x18x128xf32, #tpu.memory_space<vmem>>, vector<1x16x128xf32>
    %c0_47 = arith.constant 0 : index
    %c1_48 = arith.constant 1 : index
    %c0_49 = arith.constant 0 : index
    %36 = vector.load %arg12[%c0_47, %c1_48, %c0_49] : memref<1x18x128xf32, #tpu.memory_space<vmem>>, vector<1x16x128xf32>
    %c0_50 = arith.constant 0 : index
    %c2_51 = arith.constant 2 : index
    %c0_52 = arith.constant 0 : index
    %37 = vector.load %arg12[%c0_50, %c2_51, %c0_52] : memref<1x18x128xf32, #tpu.memory_space<vmem>>, vector<1x16x128xf32>
    %38 = tpu.concatenate %35, %36, %37 in 2 : vector<1x16x128xf32>, vector<1x16x128xf32>, vector<1x16x128xf32> -> vector<1x16x384xf32>
    %39 = vector.shape_cast %38 : vector<1x16x384xf32> to vector<16x384xf32>
    %c0_53 = arith.constant 0 : index
    %c0_54 = arith.constant 0 : index
    %40 = vector.load %arg6[%c0_53, %c0_54] : memref<384x128xf32, #tpu.memory_space<vmem>>, vector<384x128xf32>
    %cst_55 = arith.constant dense<0.000000e+00> : vector<16x128xf32>
    %41 = tpu.matmul %39, %40, %cst_55 {dimension_numbers = #tpu.dot_dimension_numbers<[1], [0], [0], [1], [0, 0, 1, 1], [], []>} : vector<16x384xf32>, vector<384x128xf32>, vector<16x128xf32> -> vector<16x128xf32>
    %c0_56 = arith.constant 0 : index
    %c0_57 = arith.constant 0 : index
    %42 = vector.load %arg7[%c0_56, %c0_57] : memref<1x128xf32, #tpu.memory_space<vmem>>, vector<1x128xf32>
    %43 = vector.broadcast %42 : vector<1x128xf32> to vector<16x128xf32>
    %44 = arith.addf %41, %43 : vector<16x128xf32>
    %cst_58 = arith.constant 0.000000e+00 : f32
    %45 = vector.broadcast %cst_58 : f32 to vector<16x128xf32>
    %46 = arith.maximumf %44, %45 : vector<16x128xf32>
    %47 = vector.shape_cast %46 : vector<16x128xf32> to vector<1x16x128xf32>
    %cst_59 = arith.constant dense<0.000000e+00> : vector<1x128xf32>
    %48 = vector.multi_reduction <add>, %47, %cst_59 [1] : vector<1x16x128xf32> to vector<1x128xf32>
    %cst_60 = arith.constant 1.600000e+01 : f32
    %49 = vector.broadcast %cst_60 : f32 to vector<1x128xf32>
    %50 = arith.divf %48, %49 : vector<1x128xf32>
    %c0_61 = arith.constant 0 : index
    %c0_62 = arith.constant 0 : index
    %51 = vector.load %arg8[%c0_61, %c0_62] : memref<128x2xf32, #tpu.memory_space<vmem>>, vector<128x2xf32>
    %cst_63 = arith.constant dense<0.000000e+00> : vector<1x2xf32>
    %52 = tpu.matmul %50, %51, %cst_63 {dimension_numbers = #tpu.dot_dimension_numbers<[1], [0], [0], [1], [0, 0, 1, 1], [], []>} : vector<1x128xf32>, vector<128x2xf32>, vector<1x2xf32> -> vector<1x2xf32>
    %c0_64 = arith.constant 0 : index
    %c0_65 = arith.constant 0 : index
    %53 = vector.load %arg9[%c0_64, %c0_65] : memref<1x2xf32, #tpu.memory_space<vmem>>, vector<1x2xf32>
    %54 = arith.addf %52, %53 : vector<1x2xf32>
    %c0_66 = arith.constant 0 : index
    %c0_67 = arith.constant 0 : index
    %c0_68 = arith.constant 0 : index
    %55 = vector.load %arg10[%c0_66, %c0_67, %c0_68] : memref<1x1x2xf32, #tpu.memory_space<vmem>>, vector<1x1x2xf32>
    %56 = vector.shape_cast %55 : vector<1x1x2xf32> to vector<1x2xf32>
    %57 = vector.shape_cast %54 : vector<1x2xf32> to vector<1x1x2xf32>
    tpu.vector_store %arg10[%c0_66, %c0_67, %c0_68], %57 {strides = array<i32>} : memref<1x1x2xf32, #tpu.memory_space<vmem>>, vector<1x1x2xf32>,
    return
  }
  func.func @transform_0(%arg0: i32) -> (i32, i32, i32) {
    %c0_i32 = arith.constant 0 : i32
    %c0_i32_0 = arith.constant 0 : i32
    %c0_i32_1 = arith.constant 0 : i32
    return %arg0, %c0_i32, %c0_i32_0 : i32, i32, i32
  }
  func.func @transform_1(%arg0: i32) -> (i32, i32) {
    %c0_i32 = arith.constant 0 : i32
    %c0_i32_0 = arith.constant 0 : i32
    %c0_i32_1 = arith.constant 0 : i32
    return %c0_i32, %c0_i32_0 : i32, i32
  }
  func.func @transform_2(%arg0: i32) -> (i32, i32) {
    %c0_i32 = arith.constant 0 : i32
    %c0_i32_0 = arith.constant 0 : i32
    %c0_i32_1 = arith.constant 0 : i32
    return %c0_i32, %c0_i32_0 : i32, i32
  }
  func.func @transform_3(%arg0: i32) -> (i32, i32) {
    %c0_i32 = arith.constant 0 : i32
    %c0_i32_0 = arith.constant 0 : i32
    %c0_i32_1 = arith.constant 0 : i32
    return %c0_i32, %c0_i32_0 : i32, i32
  }
  func.func @transform_4(%arg0: i32) -> (i32, i32) {
    %c0_i32 = arith.constant 0 : i32
    %c0_i32_0 = arith.constant 0 : i32
    %c0_i32_1 = arith.constant 0 : i32
    return %c0_i32, %c0_i32_0 : i32, i32
  }
  func.func @transform_5(%arg0: i32) -> (i32, i32) {
    %c0_i32 = arith.constant 0 : i32
    %c0_i32_0 = arith.constant 0 : i32
    %c0_i32_1 = arith.constant 0 : i32
    return %c0_i32, %c0_i32_0 : i32, i32
  }
  func.func @transform_6(%arg0: i32) -> (i32, i32) {
    %c0_i32 = arith.constant 0 : i32
    %c0_i32_0 = arith.constant 0 : i32
    %c0_i32_1 = arith.constant 0 : i32
    return %c0_i32, %c0_i32_0 : i32, i32
  }
  func.func @transform_7(%arg0: i32) -> (i32, i32) {
    %c0_i32 = arith.constant 0 : i32
    %c0_i32_0 = arith.constant 0 : i32
    %c0_i32_1 = arith.constant 0 : i32
    return %c0_i32, %c0_i32_0 : i32, i32
  }
  func.func @transform_8(%arg0: i32) -> (i32, i32) {
    %c0_i32 = arith.constant 0 : i32
    %c0_i32_0 = arith.constant 0 : i32
    %c0_i32_1 = arith.constant 0 : i32
    return %c0_i32, %c0_i32_0 : i32, i32
  }
  func.func @transform_9(%arg0: i32) -> (i32, i32, i32) {
    %c0_i32 = arith.constant 0 : i32
    %c0_i32_0 = arith.constant 0 : i32
    %c0_i32_1 = arith.constant 0 : i32
    return %arg0, %c0_i32, %c0_i32_0 : i32, i32, i32
  }
}

</mosaic_0001>

<bundles_post_ra>
// kernel: tpu_custom_call.1
= control target key start
LH: loop header
LB: loop body
LE: loop exit
PB: predicated region body
PF: predicated region fallthrough
CT: control target
= control target key end

     0   :  { %14 = vsyncpa [#allocation5], 0  ;;  %s2199_s0 = inlined_call_operand.vmem [shape: f32[2,16,14], index: 0, kind: input, shape index: {}]   ;;  %s2200_s1 = inlined_call_operand.vmem [shape: f32[14,128], index: 1, kind: input, shape index: {}]   ;;  %s2201_s2 = inlined_call_operand.vmem [shape: f32[1,128], index: 2, kind: input, shape index: {}]   ;;  %s2202_s3 = inlined_call_operand.hbm [shape: f32[640,128], index: 3, kind: input, shape index: {}]   ;;  %s2203_s4 = inlined_call_operand.vmem [shape: f32[1,128], index: 4, kind: input, shape index: {}]   ;;  %s2204_s5 = inlined_call_operand.hbm [shape: f32[384,128], index: 5, kind: input, shape index: {}]   ;;  %s2205_s6 = inlined_call_operand.vmem [shape: f32[1,128], index: 6, kind: input, shape index: {}]   ;;  %s2206_s7 = inlined_call_operand.vmem [shape: f32[128,2], index: 7, kind: input, shape index: {}]   ;;  %s2207_s8 = inlined_call_operand.vmem [shape: f32[1,2], index: 8, kind: input, shape index: {}]   ;;  %s2208_s9 = inlined_call_operand.hbm [shape: f32[2,1,2], index: 9, kind: output, shape index: {}]  }
   0x1   :  { %15 = vsyncpa [#allocation8], 0 }
   0x2   :  { %16 = vsyncpa [#allocation6], 0 }
   0x3   :  { %18 = vsyncpa [#allocation6 + $0x1], 0  ;;  %s1938_s30 = smov 0   ;;  %s1940_s10 = smov 0  }
   0x4   :  { %s1942_s11 = smov 0   ;;  %s1944_s12 = smov 0  }
   0x5 LB: > { %2215 = sst [smem:[#allocation13_spill]] %s1873_s11  ;;  %s1959_s13 = sadd.s32 4294967295, %s1877_s12   ;;  %s1877_s12 = sphi %s1944_s12, %s2231_s12   ;;  %s1873_s11 = sphi %s1942_s11, %s2233_s11   ;;  %s1869_s10 = sphi %s1940_s10, %s2235_s10   ;;  %s1865_s30 = sphi %s1938_s30, %s2234_s30  }
   0x6   : > { %s1192_s14 = sadd.s32 4294967294, %s1877_s12   ;;  %s1963_s15 = sadd.s32 1, %s1877_s12  }
   0x7   : > { %2216 = sst [smem:[#allocation14_spill]] %s1963_s15  ;;  %s225_s16 = sadd.s32 1, %s1873_s11 }
   0x8   : > { %s222_s17 = ssub.s32 %s1877_s12, %s1963_s15  ;;  %p235_p0 = scmp.ne.s32.totalorder %s1873_s11, %s1869_s10 }
   0x9   : > { %p223_p1 = scmp.eq.s32.totalorder %s222_s17, 0  ;;  %p236_p2 = scmp.eq.s32.totalorder %s1959_s13, 1 }
   0xa   : > { %p241_p3 = scmp.ne.s32.totalorder %s1869_s10, %s1865_s30  ;;  %p242_p4 = scmp.eq.s32.totalorder %s1192_s14, 1 }
   0xb   : > { %s1974_s18 = scalar_select %p223_p1, %s1873_s11, %s225_s16  }
   0xc   : > { %p1976_p5 = por %p236_p2, %p235_p0  ;;  %p1980_p6 = por %p242_p4, %p241_p3 }
   0xd   : > { %2217 = sst [smem:[#allocation15_spill]] %s1974_s18  ;;  %p1193_p7 = scmp.ge.s32.totalorder %s1877_s12, 1 }
   0xe   : > { %s2218_s19 = scalar_select %p1976_p5, 1, 0 }
   0xf   : > { %s2219_s20 = scalar_select %p1980_p6, 1, 0 }
  0x10   : > { %p249_p8 = scmp.lt.s32.totalorder %s1877_s12, 3  ;;  %p2209_p9 = scmp.eq.s32.totalorder %s1959_s13, 0 }
  0x11   : > { %s1879_s22 = smov [#allocation4]   ;;  %s1880_s25 = smov [#allocation7]  }
  0x12   : > { %p1987_p10 = pnand %p1193_p7, %p249_p8  ;;  %s267_s23 = sshll.u32 %s1879_s22, 4  ;;  %s268_s23 = int_to_ptr.vmem [resolvable:$true] %s267_s23 }
  0x13   : > { %s283_s26 = sshll.u32 %s1880_s25, 4  ;;  %s1751_s29 = scalar_lea.hbm %s2202_s3, 10240  ;;  %s1999_s26 = int_to_ptr.vmem [resolvable:$true] %s283_s26 }
  0x14   : > { %s2220_s21 = scalar_select %p1987_p10, 1, 0 }
  0x15   : > { %p1695_p11 = pneg %p1987_p10  ;;  %p1752_p13 = scmp.ne.s32.totalorder %s2202_s3, %s1751_s29 }
  0x16   : > { %p1758_p3 = scmp.lt.u32.totalorder %s1751_s29, %s2202_s3 }
  0x17   : > { %p1995_p12 = pnand %p2209_p9, %p1695_p11 }
  0x19   : > { %p1753_p0 = pneg %p1995_p12 }
  0x1b   : > { %p1754_p1 = pnand %p1753_p0, %p1752_p13 }
  0x1d   : > { %p1755_p2 = pneg %p1754_p1 }
  0x1f   : > { %p1760_p4 = pnand %p1758_p3, %p1755_p2 }
  0x21   : > { %1763 = shalt.err (!%p1760_p4)
}
  0x22   : > { %s1764_s25 = scalar_lea.vmem %s268_s23, 10240  ;;  %p1772_p9 = scmp.lt.s32.totalorder %s268_s23, %s268_s23 }
  0x23   : > { %p1765_p7 = scmp.ne.s32.totalorder %s268_s23, %s1764_s25  ;;  %p1773_p6 = scmp.lt.s32.totalorder %s1764_s25, %s1764_s25 }
  0x25   : > { %p1767_p8 = pnand %p1765_p7, %p1753_p0  ;;  %p1774_p5 = por %p1773_p6, %p1772_p9 }
  0x27   : > { %p1768_p11 = pneg %p1767_p8 }
  0x29   : > { %p1775_p10 = pnand %p1774_p5, %p1768_p11 }
  0x2b   : > { %1778 = shalt.err (!%p1775_p10)
}
  0x2c   : > { %s1881_s27 = smov 128   ;;  %s1882_s28 = smov 8  }
  0x2d   : > { %1698 = dma.hbm_to_vmem [thread:$0]  (!%p1995_p12), %s2202_s3, 10240, %s268_s23, [#allocation5], %s1881_s27, %s1881_s27, %s1882_s28  }
  0x2e   : > { %s1779_s22 = scalar_lea.hbm %s2204_s5, 6144 }
  0x2f   : > { %p1780_p13 = scmp.ne.s32.totalorder %s2204_s5, %s1779_s22  ;;  %p1786_p9 = scmp.lt.u32.totalorder %s1779_s22, %s2204_s5 }
  0x31   : > { %p1782_p5 = pnand %p1780_p13, %p1753_p0 }
  0x33   : > { %p1783_p6 = pneg %p1782_p5 }
  0x35   : > { %p1788_p10 = pnand %p1786_p9, %p1783_p6 }
  0x37   : > { %1791 = shalt.err (!%p1788_p10)
}
  0x38   : > { %s1792_s23 = scalar_lea.vmem %s1999_s26, 6144  ;;  %p1800_p4 = scmp.lt.s32.totalorder %s1999_s26, %s1999_s26 }
  0x39   : > { %p1793_p1 = scmp.ne.s32.totalorder %s1999_s26, %s1792_s23  ;;  %p1801_p7 = scmp.lt.s32.totalorder %s1792_s23, %s1792_s23 }
  0x3b   : > { %p1795_p2 = pnand %p1793_p1, %p1753_p0  ;;  %p1802_p8 = por %p1801_p7, %p1800_p4 }
  0x3d   : > { %p1796_p3 = pneg %p1795_p2 }
  0x3f   : > { %p1803_p11 = pnand %p1802_p8, %p1796_p3 }
  0x41   : > { %1806 = shalt.err (!%p1803_p11)
}
  0x42   : > { %1701 = dma.hbm_to_vmem [thread:$0]  (!%p1995_p12), %s2204_s5, 6144, %s1999_s26, [#allocation8], %s1881_s27, %s1881_s27, %s1882_s28  }
  0x43   : > { %p2222_p13 = scmp.ne.s32.totalorder %s2220_s21, 0 }
  0x44   : > { %p2223_p5 = scmp.eq.s32.totalorder (!%p2222_p13), %s1959_s13, 0 }
  0x45   : > { %316 = sbr.rel (%p2222_p13) target bundleno = 1043 (0x413), region = 56 }
  0x4c   : > { %1852 = dma.done.wait (%p2223_p5), [#allocation5], 10240   ;;  %p2224_p0 = pmov %p2223_p5 }
  0x4e   : > { %1854 = vsyncadd (%p2224_p0), [#allocation5], 4294957056  ;;  %p2225_p6 = pmov %p2224_p0 }
  0x4f   : > { %p2226_p9 = pmov %p2224_p0 }
  0x50   : > { %1856 = dma.done.wait (%p2225_p6), [#allocation8], 6144  }
  0x51   : > { %1858 = vsyncadd (%p2226_p9), [#allocation8], 4294961152  ;;  %p355_p10 = scmp.lt.s32.totalorder %s1959_s13, 1  ;;  %vm378_vm0 = vcmask 1045504   ;;  %vm371_vm1 = vcmask 113664   ;;  %vm1883_vm2 = vmmov 1  }
  0x52   : > { %vm2063_vm3 = vmpackc.low %vm378_vm0, %vm1883_vm2  ;;  %v362_v1 = vld [vmem:[%s2200_s1] sm:$0xff]  ;;  %v363_v2 = vld [vmem:[%s2200_s1 + $0x8] sm:$0x3f]  ;;  %vm1886_vm4 = vmmov 0   ;;  %s353_s21 = sand.u32 1, %s1869_s10   ;;  %s1208_s28 = sshll.u32 %s1959_s13, 4 }
  0x53   : > { %s356_s18 = scalar_select %p355_p10, %s1959_s13, 1  ;;  %v1495_v4 = vpack.c.bf16 %v363_v2, %v362_v1  ;;  %v489_v5 = vld [vmem:[#allocation4 + $0x80] sm:$0xff]  ;;  %v490_v6 = vld [vmem:[#allocation4 + $0x88] sm:$0xff]  ;;  %v491_v18 = vld [vmem:[#allocation4 + $0x90] sm:$0xff]  ;;  %vm1100_vm5 = vcmask 8192  }
  0x54   : > { %v1501_v8 = vpack.c.bf16 %v490_v6, %v489_v5  ;;  %v473_v9 = vld [vmem:[#allocation4] sm:$0xff]  ;;  %v474_v10 = vld [vmem:[#allocation4 + $0x8] sm:$0xff]  ;;  %v492_v19 = vld [vmem:[#allocation4 + $0x98] sm:$0xff]  ;;  %s354_s29 = scalar_lea.vmem [#allocation9], %s353_s21  ;;  %s2157_s22 = scalar_lea.hbm %s2208_s9, %s1208_s28 }
  0x55   : > { %s1211_s24 = sshll.u32 %s356_s18, 4  ;;  %v521_v11 = vld [vmem:[#allocation4 + $0x180] sm:$0xff]  ;;  %1497 = vmatprep.subr.msk.bf16.mxu0 %vm2063_vm3, %v1495_v4  ;;  %v1503_v12 = vpack.c.bf16 %v474_v10, %v473_v9  ;;  %v522_v13 = vld [vmem:[#allocation4 + $0x188] sm:$0xff]  ;;  %v475_v20 = vld [vmem:[#allocation4 + $0x10] sm:$0xff]  ;;  %v1505_v21 = vpack.c.bf16 %v492_v19, %v491_v18  ;;  %s1115_s14 = sshll.u32 %s354_s29, 4  ;;  %s2159_s14 = int_to_ptr.vmem [resolvable:$true] %s1115_s14 }
  0x56   : > { %s359_s27 = scalar_lea.vmem %s2199_s0, %s1211_s24  ;;  %v505_v14 = vld [vmem:[#allocation4 + $0x100] sm:$0xff]  ;;  %v506_v15 = vld [vmem:[#allocation4 + $0x108] sm:$0xff]  ;;  %1500 = vmatpush3.bf16.msk.msra.mxu0 %vm2063_vm3, %v1495_v4  ;;  %1502 = vmatprep.subr.bf16.mxu1 %v1501_v8  ;;  %v1533_v16 = vpack.c.bf16 %v522_v13, %v521_v11  ;;  %v476_v22 = vld [vmem:[#allocation4 + $0x18] sm:$0xff]  ;;  %s1103_s25 = scalar_lea.sflag [#allocation6], %s353_s21 }
  0x57   : > { %v360_v3 = vld [vmem:[%s359_s27] sm:$0xff]  ;;  %v361_v7 = vld [vmem:[%s359_s27 + $0x8] sm:$0xff]  ;;  %v1535_v17 = vpack.c.bf16 %v506_v15, %v505_v14  ;;  %1504 = vmatpush3.bf16.msra.mxu1 %v1503_v12  ;;  %v1507_v25 = vpack.c.bf16 %v476_v22, %v475_v20  ;;  %v493_v29 = vld [vmem:[#allocation4 + $0xa0] sm:$0xff]  ;;  %s1807_s23 = scalar_lea.vmem %s2159_s14, 16  ;;  %p2229_p1 = scmp.ne.s32.totalorder %s2218_s19, 0 }
  0x58   : > { %1387 = vmatprep.mubr.msk.f32.mxu0 %vm371_vm1, %v360_v3  ;;  %v523_v23 = vld [vmem:[#allocation4 + $0x190] sm:$0xff]  ;;  %v524_v24 = vld [vmem:[#allocation4 + $0x198] sm:$0xff]  ;;  %1534 = vmatprep.subr.bf16.mxu0 %v1533_v16  ;;  %v494_v30 = vld [vmem:[#allocation4 + $0xa8] sm:$0xff]  ;;  %p1808_p12 = scmp.ne.s32.totalorder %s2159_s14, %s1807_s23  ;;  %s1887_s13 = smov [#allocation9]  }
  0x59   : > { %v1537_v26 = vpack.c.bf16 %v524_v24, %v523_v23  ;;  %v507_v27 = vld [vmem:[#allocation4 + $0x110] sm:$0xff]  ;;  %v508_v28 = vld [vmem:[#allocation4 + $0x118] sm:$0xff]  ;;  %1388 = vmatmul.mubr.msk.f32.vlgmr.msra.gmra.mrb[0].mxu0 %vm371_vm1, %v361_v7  ;;  %1506 = vmatprep.subr.bf16.mxu1 %v1505_v21  ;;  %v477_v31 = vld [vmem:[#allocation4 + $0x20] sm:$0xff]  ;;  %v1509_v34 = vpack.c.bf16 %v494_v30, %v493_v29  ;;  %v1884_v24 = vmov 0.0   ;;  %s1811_s11 = sshll.u32 %s1887_s13, 4  ;;  %s1812_s11 = int_to_ptr.vmem [resolvable:$false] %s1811_s11 }
  0x5a   : > { %v478_v32 = vld [vmem:[#allocation4 + $0x28] sm:$0xff]  ;;  %1536 = vmatpush3.bf16.msra.mxu0 %v1535_v17  ;;  %v1539_v33 = vpack.c.bf16 %v508_v28, %v507_v27  ;;  %v525_v35 = vld [vmem:[#allocation4 + $0x1a0] sm:$0xff]  ;;  %v495_v41 = vld [vmem:[#allocation4 + $0xb0] sm:$0xff]  ;;  %459 = vst [vmem:[#allocation2] sm:$0x3] %v1884_v24  ;;  %p1809_p2 = pnand %p1808_p12, %p2229_p1  ;;  %s1813_s15 = scalar_lea.vmem %s1812_s11, 32 }
  0x5b   : > { %v526_v36 = vld [vmem:[#allocation4 + $0x1a8] sm:$0xff]  ;;  %v509_v37 = vld [vmem:[#allocation4 + $0x120] sm:$0xff]  ;;  %1508 = vmatpush3.bf16.msra.mxu1 %v1507_v25  ;;  %1538 = vmatprep.subr.bf16.mxu0 %v1537_v26  ;;  %v1511_v38 = vpack.c.bf16 %v478_v32, %v477_v31  ;;  %v496_v42 = vld [vmem:[#allocation4 + $0xb8] sm:$0xff]  ;;  %460 = vst [vmem:[#allocation2 + $0x12] sm:$0x3] %v1884_v24  ;;  %p1814_p4 = scmp.lt.s32.totalorder %s2159_s14, %s1812_s11  ;;  %p1815_p7 = scmp.lt.s32.totalorder %s1813_s15, %s1807_s23 }
  0x5c   : > { %v1541_v39 = vpack.c.bf16 %v526_v36, %v525_v35  ;;  %v510_v40 = vld [vmem:[#allocation4 + $0x128] sm:$0xff]  ;;  %1510 = vmatprep.subr.bf16.mxu1 %v1509_v34  ;;  %v1513_v43 = vpack.c.bf16 %v496_v42, %v495_v41  ;;  %v479_v44 = vld [vmem:[#allocation4 + $0x30] sm:$0xff]  ;;  %v480_v45 = vld [vmem:[#allocation4 + $0x38] sm:$0xff]  ;;  %787 = vst [vmem:[#allocation3] sm:$0x1] %v1884_v24  ;;  %p1810_p3 = pneg %p1809_p2 }
  0x5d   : > { %v527_v46 = vld [vmem:[#allocation4 + $0x1b0] sm:$0xff]  ;;  %v528_v47 = vld [vmem:[#allocation4 + $0x1b8] sm:$0xff]  ;;  %v1543_v48 = vpack.c.bf16 %v510_v40, %v509_v37  ;;  %v497_v49 = vld [vmem:[#allocation4 + $0xc0] sm:$0xff]  ;;  %v1515_v51 = vpack.c.bf16 %v480_v45, %v479_v44  ;;  %788 = vst [vmem:[#allocation3 + $0x11] sm:$0x1] %v1884_v24  ;;  %p1816_p8 = por %p1815_p7, %p1814_p4 }
  0x5e   : > { %1540 = vmatpush3.bf16.msra.mxu0 %v1539_v33  ;;  %v498_v50 = vld [vmem:[#allocation4 + $0xc8] sm:$0xff]  ;;  %v1545_v52 = vpack.c.bf16 %v528_v47, %v527_v46  ;;  %v511_v53 = vld [vmem:[#allocation4 + $0x130] sm:$0xff]  ;;  %v512_v54 = vld [vmem:[#allocation4 + $0x138] sm:$0xff] }
  0x5f   : > { %1512 = vmatpush3.bf16.msra.mxu1 %v1511_v38  ;;  %1542 = vmatprep.subr.bf16.mxu0 %v1541_v39  ;;  %v481_v55 = vld [vmem:[#allocation4 + $0x40] sm:$0xff]  ;;  %v1517_v56 = vpack.c.bf16 %v498_v50, %v497_v49  ;;  %v482_v57 = vld [vmem:[#allocation4 + $0x48] sm:$0xff]  ;;  %v1547_v60 = vpack.c.bf16 %v512_v54, %v511_v53  ;;  %v499_v2 = vld [vmem:[#allocation4 + $0xd0] sm:$0xff]  ;;  %p1817_p11 = pnand %p1816_p8, %p1810_p3 }
  0x60   : > { %1514 = vmatprep.subr.bf16.mxu1 %v1513_v43  ;;  %v529_v58 = vld [vmem:[#allocation4 + $0x1c0] sm:$0xff]  ;;  %v530_v59 = vld [vmem:[#allocation4 + $0x1c8] sm:$0xff]  ;;  %v1519_v61 = vpack.c.bf16 %v482_v57, %v481_v55  ;;  %v500_v3 = vld [vmem:[#allocation4 + $0xd8] sm:$0xff] }
  0x61   : > { %v1549_v62 = vpack.c.bf16 %v530_v59, %v529_v58  ;;  %v513_v63 = vld [vmem:[#allocation4 + $0x140] sm:$0xff]  ;;  %v514_v0 = vld [vmem:[#allocation4 + $0x148] sm:$0xff]  ;;  %v1521_v4 = vpack.c.bf16 %v500_v3, %v499_v2  ;;  %v483_v5 = vld [vmem:[#allocation4 + $0x50] sm:$0xff] }
  0x62   : > { %1544 = vmatpush3.bf16.msra.mxu0 %v1543_v48  ;;  %v1551_v1 = vpack.c.bf16 %v514_v0, %v513_v63  ;;  %v484_v6 = vld [vmem:[#allocation4 + $0x58] sm:$0xff]  ;;  %v531_v8 = vld [vmem:[#allocation4 + $0x1d0] sm:$0xff]  ;;  %v501_v14 = vld [vmem:[#allocation4 + $0xe0] sm:$0xff] }
  0x63   : > { %1516 = vmatpush3.bf16.msra.mxu1 %v1515_v51  ;;  %1546 = vmatprep.subr.bf16.mxu0 %v1545_v52  ;;  %v1523_v7 = vpack.c.bf16 %v484_v6, %v483_v5  ;;  %v532_v9 = vld [vmem:[#allocation4 + $0x1d8] sm:$0xff]  ;;  %v515_v10 = vld [vmem:[#allocation4 + $0x150] sm:$0xff]  ;;  %v502_v15 = vld [vmem:[#allocation4 + $0xe8] sm:$0xff] }
  0x64   : > { %1518 = vmatprep.subr.bf16.mxu1 %v1517_v56  ;;  %v1553_v11 = vpack.c.bf16 %v532_v9, %v531_v8  ;;  %v516_v12 = vld [vmem:[#allocation4 + $0x158] sm:$0xff]  ;;  %v1525_v16 = vpack.c.bf16 %v502_v15, %v501_v14  ;;  %v485_v17 = vld [vmem:[#allocation4 + $0x60] sm:$0xff]  ;;  %v486_v18 = vld [vmem:[#allocation4 + $0x68] sm:$0xff] }
  0x65   : > { %v1555_v13 = vpack.c.bf16 %v516_v12, %v515_v10  ;;  %v533_v19 = vld [vmem:[#allocation4 + $0x1e0] sm:$0xff]  ;;  %v1527_v20 = vpack.c.bf16 %v486_v18, %v485_v17  ;;  %v534_v21 = vld [vmem:[#allocation4 + $0x1e8] sm:$0xff]  ;;  %v503_v27 = vld [vmem:[#allocation4 + $0xf0] sm:$0xff] }
  0x66   : > { %1548 = vmatpush3.bf16.msra.mxu0 %v1547_v60  ;;  %v517_v22 = vld [vmem:[#allocation4 + $0x160] sm:$0xff]  ;;  %v518_v23 = vld [vmem:[#allocation4 + $0x168] sm:$0xff]  ;;  %v1557_v25 = vpack.c.bf16 %v534_v21, %v533_v19  ;;  %v504_v28 = vld [vmem:[#allocation4 + $0xf8] sm:$0xff] }
  0x67   : > { %1520 = vmatpush3.bf16.msra.mxu1 %v1519_v61  ;;  %1550 = vmatprep.subr.bf16.mxu0 %v1549_v62  ;;  %v1559_v26 = vpack.c.bf16 %v518_v23, %v517_v22  ;;  %v487_v29 = vld [vmem:[#allocation4 + $0x70] sm:$0xff]  ;;  %v1529_v30 = vpack.c.bf16 %v504_v28, %v503_v27  ;;  %v488_v31 = vld [vmem:[#allocation4 + $0x78] sm:$0xff]  ;;  %v537_v39 = vld [vmem:[#allocation4 + $0x200] sm:$0xff] }
  0x68   : > { %1522 = vmatprep.subr.bf16.mxu1 %v1521_v4  ;;  %v535_v32 = vld [vmem:[#allocation4 + $0x1f0] sm:$0xff]  ;;  %v536_v33 = vld [vmem:[#allocation4 + $0x1f8] sm:$0xff]  ;;  %v1531_v34 = vpack.c.bf16 %v488_v31, %v487_v29  ;;  %v538_v40 = vld [vmem:[#allocation4 + $0x208] sm:$0xff] }
  0x69   : > { %v1561_v35 = vpack.c.bf16 %v536_v33, %v535_v32  ;;  %v519_v36 = vld [vmem:[#allocation4 + $0x170] sm:$0xff]  ;;  %v520_v37 = vld [vmem:[#allocation4 + $0x178] sm:$0xff]  ;;  %v1565_v41 = vpack.c.bf16 %v538_v40, %v537_v39  ;;  %v541_v55 = vld [vmem:[#allocation4 + $0x220] sm:$0xff] }
  0x6a   : > { %1552 = vmatpush3.bf16.msra.mxu0 %v1551_v1  ;;  %v1563_v38 = vpack.c.bf16 %v520_v37, %v519_v36  ;;  %v1202_v42 = vld [vmem:[%s2201_s2] ss:$0 sm:$0xff]  ;;  %v540_v50 = vld [vmem:[#allocation4 + $0x218] sm:$0xff]  ;;  %v542_v56 = vld [vmem:[#allocation4 + $0x228] sm:$0xff] }
  0x6b   : > { %1524 = vmatpush3.bf16.msra.mxu1 %v1523_v7  ;;  %1554 = vmatprep.subr.bf16.mxu0 %v1553_v11  ;;  %v539_v49 = vld [vmem:[#allocation4 + $0x210] sm:$0xff]  ;;  %v1573_v59 = vpack.c.bf16 %v542_v56, %v541_v55  ;;  %v544_v62 = vld [vmem:[#allocation4 + $0x238] sm:$0xff]  ;;  %v545_v1 = vld [vmem:[#allocation4 + $0x240] sm:$0xff] }
  0x6c   : > { %1526 = vmatprep.subr.bf16.mxu1 %v1525_v16  ;;  %v1569_v54 = vpack.c.bf16 %v540_v50, %v539_v49  ;;  %v543_v61 = vld [vmem:[#allocation4 + $0x230] sm:$0xff]  ;;  %v546_v2 = vld [vmem:[#allocation4 + $0x248] sm:$0xff]  ;;  %v548_v5 = vld [vmem:[#allocation4 + $0x258] sm:$0xff] }
  0x6d   : > { %v1577_v0 = vpack.c.bf16 %v544_v62, %v543_v61  ;;  %v1581_v3 = vpack.c.bf16 %v546_v2, %v545_v1  ;;  %v547_v4 = vld [vmem:[#allocation4 + $0x250] sm:$0xff]  ;;  %v549_v7 = vld [vmem:[#allocation4 + $0x260] sm:$0xff]  ;;  %v550_v8 = vld [vmem:[#allocation4 + $0x268] sm:$0xff] }
  0x6e   : > { %1556 = vmatpush3.bf16.msra.mxu0 %v1555_v13  ;;  %v1585_v6 = vpack.c.bf16 %v548_v5, %v547_v4  ;;  %v1589_v9 = vpack.c.bf16 %v550_v8, %v549_v7  ;;  %v551_v10 = vld [vmem:[#allocation4 + $0x270] sm:$0xff]  ;;  %v552_v11 = vld [vmem:[#allocation4 + $0x278] sm:$0xff]  ;;  %v813_v14 = vld [vmem:[#allocation7 + $0x80] sm:$0xff] }
  0x6f   : > { %1528 = vmatpush3.bf16.msra.mxu1 %v1527_v20  ;;  %1558 = vmatprep.subr.bf16.mxu0 %v1557_v25  ;;  %v1593_v12 = vpack.c.bf16 %v552_v11, %v551_v10  ;;  %v814_v15 = vld [vmem:[#allocation7 + $0x88] sm:$0xff]  ;;  %v829_v16 = vld [vmem:[#allocation7 + $0x100] sm:$0xff]  ;;  %v815_v23 = vld [vmem:[#allocation7 + $0x90] sm:$0xff] }
  0x70   : > { %1530 = vmatprep.subr.bf16.mxu1 %v1529_v30  ;;  %v1597_v17 = vpack.c.bf16 %v814_v15, %v813_v14  ;;  %v830_v18 = vld [vmem:[#allocation7 + $0x108] sm:$0xff]  ;;  %v797_v19 = vld [vmem:[#allocation7] sm:$0xff]  ;;  %v816_v25 = vld [vmem:[#allocation7 + $0x98] sm:$0xff] }
  0x71   : > { %v798_v20 = vld [vmem:[#allocation7 + $0x8] sm:$0xff]  ;;  %v1629_v21 = vpack.c.bf16 %v830_v18, %v829_v16  ;;  %v1601_v27 = vpack.c.bf16 %v816_v25, %v815_v23  ;;  %v832_v28 = vld [vmem:[#allocation7 + $0x118] sm:$0xff]  ;;  %v799_v29 = vld [vmem:[#allocation7 + $0x10] sm:$0xff]  ;;  %v1885_v23 = vmov 0.0|0.0  }
  0x72   : > { %1560 = vmatpush3.bf16.msra.mxu0 %v1559_v26  ;;  %v1599_v22 = vpack.c.bf16 %v798_v20, %v797_v19  ;;  %v831_v26 = vld [vmem:[#allocation7 + $0x110] sm:$0xff]  ;;  %v800_v30 = vld [vmem:[#allocation7 + $0x18] sm:$0xff]  ;;  %v817_v33 = vld [vmem:[#allocation7 + $0xa0] sm:$0xff] }
  0x73   : > { %1562 = vmatprep.subr.bf16.mxu0 %v1561_v35  ;;  %1532 = vmatpush3.bf16.msra.mxu1 %v1531_v34  ;;  %v1633_v31 = vpack.c.bf16 %v832_v28, %v831_v26  ;;  %v1603_v32 = vpack.c.bf16 %v800_v30, %v799_v29  ;;  %v818_v34 = vld [vmem:[#allocation7 + $0xa8] sm:$0xff]  ;;  %v833_v35 = vld [vmem:[#allocation7 + $0x120] sm:$0xff]  ;;  %v824_v61 = vld [vmem:[#allocation7 + $0xd8] sm:$0xff] }
  0x74   : > { %1566 = vmatprep.subr.bf16.mxu1 %v1565_v41  ;;  %v1605_v36 = vpack.c.bf16 %v818_v34, %v817_v33  ;;  %v834_v37 = vld [vmem:[#allocation7 + $0x128] sm:$0xff]  ;;  %v821_v50 = vld [vmem:[#allocation7 + $0xc0] sm:$0xff]  ;;  %v807_v1 = vld [vmem:[#allocation7 + $0x50] sm:$0xff] }
  0x75   : > { %v802_v39 = vld [vmem:[#allocation7 + $0x28] sm:$0xff]  ;;  %v1637_v40 = vpack.c.bf16 %v834_v37, %v833_v35  ;;  %v825_v5 = vld [vmem:[#allocation7 + $0xe0] sm:$0xff]  ;;  %v827_v14 = vld [vmem:[#allocation7 + $0xf0] sm:$0xff] }
  0x76   : > { %1564 = vmatpush3.bf16.msra.mxu0 %v1563_v38  ;;  %v801_v38 = vld [vmem:[#allocation7 + $0x20] sm:$0xff]  ;;  %v828_v15 = vld [vmem:[#allocation7 + $0xf8] sm:$0xff]  ;;  %v843_v16 = vld [vmem:[#allocation7 + $0x170] sm:$0xff] }
  0x77   : > { %1598 = vmatprep.subr.bf16.mxu0 %v1597_v17  ;;  %v841_v8 = vld [vmem:[#allocation7 + $0x160] sm:$0xff]  ;;  %v1625_v17 = vpack.c.bf16 %v828_v15, %v827_v14  ;;  %v844_v18 = vld [vmem:[#allocation7 + $0x178] sm:$0xff]  ;;  %v811_v19 = vld [vmem:[#allocation7 + $0x70] sm:$0xff] }
  0x78   : > { %v809_v10 = vld [vmem:[#allocation7 + $0x60] sm:$0xff]  ;;  %v812_v20 = vld [vmem:[#allocation7 + $0x78] sm:$0xff]  ;;  %v1207_v15 = vld [vmem:[%s2205_s6] ss:$0 sm:$0xff] }
 0x12c   : > { %v1389_v43 = vpop.f32.mrb[0].mxu0 }
 0x12d   : > { %v454_v44 = vadd.f32 %v1389_v43, %v1202_v42  ;;  %v448_v45 = vpop.f32.mrb[1].mxu0  ;;  %v835_v43 = vld [vmem:[#allocation7 + $0x130] sm:$0xff] }
 0x12e   : > { %v449_v46 = vadd.f32 %v1202_v42, %v448_v45  ;;  %v820_v42 = vld [vmem:[#allocation7 + $0xb8] sm:$0xff]  ;;  %v1607_v45 = vpack.c.bf16 %v802_v39, %v801_v38 }
 0x12f   : > { %v458_v47 = vmax.f32 %v454_v44, 0.0  ;;  %v836_v44 = vld [vmem:[#allocation7 + $0x138] sm:$0xff] }
 0x130   : > { %v457_v48 = vmax.f32 %v449_v46, 0.0  ;;  %v1641_v49 = vpack.c.bf16 %v836_v44, %v835_v43 }
 0x131   : > { %462 = vst [vmem:[#allocation2 + $0xa] sm:$0xff] %v458_v47 }
 0x132   : > { %461 = vst [vmem:[#allocation2 + $0x2] sm:$0xff] %v457_v48 }
 0x138   : > { %v470_v58 = vld [vmem:[#allocation2 + $0xb] sm:$0xff] }
 0x139   : > { %v465_v51 = vld [vmem:[#allocation2 + $0x1] sm:$0xff]  ;;  %v466_v57 = vld [vmem:[#allocation2 + $0x9] sm:$0xff] }
 0x13a   : > { %v469_v52 = vld [vmem:[#allocation2 + $0x3] sm:$0xff]  ;;  %624 = vmatprep.mubr.f32.mxu1 %v465_v51  ;;  %v472_v13 = vld [vmem:[#allocation2 + $0xc] sm:$0xff]  ;;  %v822_v51 = vld [vmem:[#allocation7 + $0xc8] sm:$0xff] }
 0x13b   : > { %v463_v53 = vld [vmem:[#allocation2] sm:$0xff]  ;;  %699 = vmatprep.mubr.f32.mxu0 %v469_v52  ;;  %v464_v60 = vld [vmem:[#allocation2 + $0x8] sm:$0xff]  ;;  %v837_v52 = vld [vmem:[#allocation7 + $0x140] sm:$0xff]  ;;  %v1613_v55 = vpack.c.bf16 %v822_v51, %v821_v50 }
 0x13c   : > { %625 = vmatmul.mubr.f32.vlgmr.msra.gmra.mrb[0].mxu1 %v463_v53  ;;  %700 = vmatmul.mubr.f32.vlgmr.msra.gmra.mrb[2].mxu0 %v457_v48  ;;  %v471_v63 = vld [vmem:[#allocation2 + $0x4] sm:$0xff]  ;;  %v838_v53 = vld [vmem:[#allocation7 + $0x148] sm:$0xff] }
 0x13d   : > { %1568 = vmatpush3.bf16.msra.mxu1 %v1565_v41  ;;  %629 = vmatprep.mubr.f32.mxu1 %v466_v57  ;;  %v819_v41 = vld [vmem:[#allocation7 + $0xb0] sm:$0xff]  ;;  %v804_v48 = vld [vmem:[#allocation7 + $0x38] sm:$0xff]  ;;  %v1645_v56 = vpack.c.bf16 %v838_v53, %v837_v52  ;;  %v805_v57 = vld [vmem:[#allocation7 + $0x40] sm:$0xff] }
 0x13e   : > { %704 = vmatprep.mubr.f32.mxu0 %v470_v58  ;;  %1570 = vmatprep.subr.bf16.mxu1 %v1569_v54  ;;  %v1609_v46 = vpack.c.bf16 %v820_v42, %v819_v41  ;;  %v806_v58 = vld [vmem:[#allocation7 + $0x48] sm:$0xff] }
 0x13f   : > { %1600 = vmatpush3.bf16.msra.mxu0 %v1599_v22  ;;  %v1627_v22 = vpack.c.bf16 %v812_v20, %v811_v19 }
 0x140   : > { %630 = vmatmul.mubr.f32.gmra.mrb[2].mxu1 %v464_v60  ;;  %705 = vmatmul.mubr.f32.gmra.mrb[4].mxu0 %v458_v47  ;;  %v803_v47 = vld [vmem:[#allocation7 + $0x30] sm:$0xff] }
 0x141   : > { %1572 = vmatpush3.bf16.msra.mxu1 %v1569_v54  ;;  %1422 = vmatprep.mubr.f32.mxu1 %v471_v63  ;;  %v1611_v54 = vpack.c.bf16 %v804_v48, %v803_v47  ;;  %v823_v60 = vld [vmem:[#allocation7 + $0xd0] sm:$0xff] }
 0x142   : > { %1574 = vmatprep.subr.bf16.mxu1 %v1573_v59  ;;  %1602 = vmatprep.subr.bf16.mxu0 %v1601_v27  ;;  %v1617_v62 = vpack.c.bf16 %v824_v61, %v823_v60  ;;  %v839_v63 = vld [vmem:[#allocation7 + $0x150] sm:$0xff]  ;;  %v1019_v61 = vld [vmem:[%s2206_s7 + $0x30] sm:$0xff] }
 0x143   : > { %1604 = vmatpush3.bf16.msra.mxu0 %v1603_v32  ;;  %v1206_v27 = vld [vmem:[%s2203_s4] ss:$0 sm:$0xff] }
 0x144   : > { %1606 = vmatprep.subr.bf16.mxu0 %v1605_v36  ;;  %v1013_v48 = vld [vmem:[%s2206_s7] sm:$0xff] }
 0x145   : > { %1576 = vmatpush3.bf16.msra.mxu1 %v1573_v59  ;;  %v1615_v59 = vpack.c.bf16 %v806_v58, %v805_v57  ;;  %v1017_v58 = vld [vmem:[%s2206_s7 + $0x20] sm:$0xff] }
 0x146   : > { %1578 = vmatprep.subr.bf16.mxu1 %v1577_v0 }
 0x147   : > { %1608 = vmatpush3.bf16.msra.mxu0 %v1607_v45 }
 0x148   : > { %1610 = vmatprep.subr.bf16.mxu0 %v1609_v46 }
 0x149   : > { %1580 = vmatpush3.bf16.msra.mxu1 %v1577_v0  ;;  %v840_v0 = vld [vmem:[#allocation7 + $0x158] sm:$0xff] }
 0x14a   : > { %1582 = vmatprep.subr.bf16.mxu1 %v1581_v3  ;;  %v1649_v2 = vpack.c.bf16 %v840_v0, %v839_v63  ;;  %v1021_v0 = vld [vmem:[%s2206_s7 + $0x40] sm:$0xff] }
 0x14b   : > { %1612 = vmatpush3.bf16.msra.mxu0 %v1611_v54 }
 0x14c   : > { %1614 = vmatprep.subr.bf16.mxu0 %v1613_v55  ;;  %v1015_v55 = vld [vmem:[%s2206_s7 + $0x10] sm:$0xff] }
 0x14d   : > { %1584 = vmatpush3.bf16.msra.mxu1 %v1581_v3  ;;  %v808_v3 = vld [vmem:[#allocation7 + $0x58] sm:$0xff] }
 0x14e   : > { %1586 = vmatprep.subr.bf16.mxu1 %v1585_v6  ;;  %v1619_v4 = vpack.c.bf16 %v808_v3, %v807_v1  ;;  %v1022_v1 = vld [vmem:[%s2206_s7 + $0x48] sm:$0xff]  ;;  %v1023_v3 = vld [vmem:[%s2206_s7 + $0x50] sm:$0xff] }
 0x14f   : > { %1616 = vmatpush3.bf16.msra.mxu0 %v1615_v59  ;;  %v1018_v59 = vld [vmem:[%s2206_s7 + $0x28] sm:$0xff] }
 0x150   : > { %1618 = vmatprep.subr.bf16.mxu0 %v1617_v62  ;;  %v1668_v60 = vpack.c.bf16 %v1018_v59, %v1017_v58  ;;  %v1020_v62 = vld [vmem:[%s2206_s7 + $0x38] sm:$0xff] }
 0x151   : > { %1588 = vmatpush3.bf16.msra.mxu1 %v1585_v6  ;;  %v826_v6 = vld [vmem:[#allocation7 + $0xe8] sm:$0xff]  ;;  %v1671_v63 = vpack.c.bf16 %v1020_v62, %v1019_v61 }
 0x152   : > { %1590 = vmatprep.subr.bf16.mxu1 %v1589_v9  ;;  %v1621_v7 = vpack.c.bf16 %v826_v6, %v825_v5  ;;  %v1025_v6 = vld [vmem:[%s2206_s7 + $0x60] sm:$0xff] }
 0x153   : > { %1620 = vmatpush3.bf16.msra.mxu0 %v1619_v4  ;;  %v1024_v4 = vld [vmem:[%s2206_s7 + $0x58] sm:$0xff] }
 0x154   : > { %1622 = vmatprep.subr.bf16.mxu0 %v1621_v7  ;;  %v1677_v5 = vpack.c.bf16 %v1024_v4, %v1023_v3  ;;  %v1026_v7 = vld [vmem:[%s2206_s7 + $0x68] sm:$0xff] }
 0x155   : > { %1592 = vmatpush3.bf16.msra.mxu1 %v1589_v9  ;;  %v842_v9 = vld [vmem:[#allocation7 + $0x168] sm:$0xff] }
 0x156   : > { %1594 = vmatprep.subr.bf16.mxu1 %v1593_v12  ;;  %v1653_v11 = vpack.c.bf16 %v842_v9, %v841_v8  ;;  %v1680_v8 = vpack.c.bf16 %v1026_v7, %v1025_v6  ;;  %v1027_v9 = vld [vmem:[%s2206_s7 + $0x70] sm:$0xff] }
 0x159   : > { %1596 = vmatpush3.bf16.msra.mxu1 %v1593_v12  ;;  %v810_v12 = vld [vmem:[#allocation7 + $0x68] sm:$0xff] }
 0x15a   : > { %1630 = vmatprep.subr.bf16.mxu1 %v1629_v21 }
 0x15c   : > { %1423 = vmatmul.mubr.f32.vlgmr.msra.gmra.mrb[4].mxu1 %v472_v13  ;;  %v1623_v13 = vpack.c.bf16 %v810_v12, %v809_v10  ;;  %v1028_v10 = vld [vmem:[%s2206_s7 + $0x78] sm:$0xff] }
 0x15d   : > { %1632 = vmatpush3.bf16.msra.mxu1 %v1629_v21  ;;  %v1657_v21 = vpack.c.bf16 %v844_v18, %v843_v16 }
 0x15e   : > { %1634 = vmatprep.subr.bf16.mxu1 %v1633_v31  ;;  %1624 = vmatpush3.bf16.msra.mxu0 %v1623_v13 }
 0x15f   : > { %1626 = vmatprep.subr.bf16.mxu0 %v1625_v17 }
 0x161   : > { %1636 = vmatpush3.bf16.msra.mxu1 %v1633_v31 }
 0x162   : > { %1638 = vmatprep.subr.bf16.mxu1 %v1637_v40  ;;  %1628 = vmatpush3.bf16.msra.mxu0 %v1627_v22 }
 0x163   : > { %1661 = vmatprep.subr.bf16.mxu0 %v1885_v23 }
 0x165   : > { %1640 = vmatpush3.bf16.msra.mxu1 %v1637_v40 }
 0x166   : > { %1642 = vmatprep.subr.bf16.mxu1 %v1641_v49 }
 0x169   : > { %1644 = vmatpush3.bf16.msra.mxu1 %v1641_v49  ;;  %v1014_v49 = vld [vmem:[%s2206_s7 + $0x8] sm:$0xff] }
 0x16a   : > { %1646 = vmatprep.subr.bf16.mxu1 %v1645_v56  ;;  %v1662_v50 = vpack.c.bf16 %v1014_v49, %v1013_v48 }
 0x16d   : > { %1648 = vmatpush3.bf16.msra.mxu1 %v1645_v56  ;;  %v1016_v56 = vld [vmem:[%s2206_s7 + $0x18] sm:$0xff] }
 0x16e   : > { %1650 = vmatprep.subr.bf16.mxu1 %v1649_v2  ;;  %v1665_v57 = vpack.c.bf16 %v1016_v56, %v1015_v55 }
 0x171   : > { %1652 = vmatpush3.bf16.msra.mxu1 %v1649_v2  ;;  %v1674_v2 = vpack.c.bf16 %v1022_v1, %v1021_v0 }
 0x172   : > { %1654 = vmatprep.subr.bf16.mxu1 %v1653_v11 }
 0x175   : > { %1656 = vmatpush3.bf16.msra.mxu1 %v1653_v11  ;;  %v1683_v11 = vpack.c.bf16 %v1028_v10, %v1027_v9 }
 0x176   : > { %1658 = vmatprep.subr.bf16.mxu1 %v1657_v21 }
 0x179   : > { %1660 = vmatpush3.bf16.msra.mxu1 %v1657_v21 }
 0x20f   : > { %v1248_v25 = vpop.f32.mrb[0].mxu1  ;;  %v1286_v26 = vpop.f32.mrb[2].mxu0 }
 0x210   : > { %v1249_v28 = vpop.f32.mrb[1].mxu1  ;;  %v1287_v29 = vpop.f32.mrb[3].mxu0 }
 0x211   : > { %v1250_v30 = vadd.f32 %v1249_v28, %v1248_v25  ;;  %v1288_v31 = vadd.f32 %v1287_v29, %v1286_v26 }
 0x213   : > { %v627_v32 = vadd.f32 %v1250_v30, %v1206_v27  ;;  %v1251_v33 = vpop.f32.mrb[2].mxu1  ;;  %v1289_v34 = vpop.f32.mrb[4].mxu0 }
 0x214   : > { %v1252_v35 = vpop.f32.mrb[3].mxu1  ;;  %v1290_v36 = vpop.f32.mrb[5].mxu0 }
 0x215   : > { %v1253_v37 = vadd.f32 %v1252_v35, %v1251_v33  ;;  %v1291_v38 = vadd.f32 %v1290_v36, %v1289_v34  ;;  %v702_v39 = vadd.f32 %v1288_v31, %v627_v32  ;;  %v1029_v35 = vld [vmem:[%s2207_s8] sm:$0x1] }
 0x217   : > { %v632_v40 = vadd.f32 %v1253_v37, %v1206_v27 }
 0x219   : > { %v707_v41 = vadd.f32 %v1291_v38, %v632_v40 }
 0x22f   : > { %v1424_v42 = vpop.f32.mrb[4].mxu1 }
 0x230   : > { %v782_v43 = vadd.f32 %v1424_v42, %v707_v41  ;;  %v776_v44 = vpop.f32.mrb[5].mxu1 }
 0x231   : > { %v777_v45 = vadd.f32 %v776_v44, %v702_v39 }
 0x232   : > { %v786_v46 = vmax.f32 %v782_v43, 0.0 }
 0x233   : > { %v785_v47 = vmax.f32 %v777_v45, 0.0 }
 0x234   : > { %790 = vst [vmem:[#allocation3 + $0x9] sm:$0xff] %v786_v46 }
 0x235   : > { %789 = vst [vmem:[#allocation3 + $0x1] sm:$0xff] %v785_v47  ;;  %916 = vmatprep.mubr.f32.mxu0 %v785_v47 }
 0x23b   : > { %v796_v53 = vld [vmem:[#allocation3 + $0xa] sm:$0xff] }
 0x23c   : > { %v795_v51 = vld [vmem:[#allocation3 + $0x2] sm:$0xff] }
 0x23d   : > { %v791_v52 = vld [vmem:[#allocation3] sm:$0xff]  ;;  %1457 = vmatprep.mubr.f32.mxu1 %v795_v51  ;;  %v792_v54 = vld [vmem:[#allocation3 + $0x8] sm:$0xff] }
 0x23e   : > { %917 = vmatmul.mubr.f32.vlgmr.msra.gmra.mrb[6].mxu0 %v791_v52  ;;  %1458 = vmatmul.mubr.f32.vlgmr.msra.gmra.mrb[6].mxu1 %v796_v53 }
 0x23f   : > { %921 = vmatprep.mubr.f32.mxu0 %v786_v46  ;;  %1663 = vmatpush3.bf16.msra.mxu0 %v1662_v50 }
 0x240   : > { %1664 = vmatprep.subr.bf16.mxu0 %v1885_v23 }
 0x242   : > { %922 = vmatmul.mubr.f32.gmra.mrb[8].mxu0 %v792_v54 }
 0x243   : > { %1666 = vmatpush3.bf16.msra.mxu0 %v1665_v57  ;;  %1492 = vmatprep.mubr.msk.f32.mxu0 %vm1886_vm4, %v1884_v24 }
 0x244   : > { %1667 = vmatprep.subr.bf16.mxu0 %v1885_v23 }
 0x247   : > { %1669 = vmatpush3.bf16.msra.mxu0 %v1668_v60 }
 0x248   : > { %1670 = vmatprep.subr.bf16.mxu0 %v1885_v23 }
 0x24b   : > { %1672 = vmatpush3.bf16.msra.mxu0 %v1671_v63 }
 0x24c   : > { %1673 = vmatprep.subr.bf16.mxu0 %v1885_v23 }
 0x24f   : > { %1675 = vmatpush3.bf16.msra.mxu0 %v1674_v2 }
 0x250   : > { %1676 = vmatprep.subr.bf16.mxu0 %v1885_v23 }
 0x253   : > { %1678 = vmatpush3.bf16.msra.mxu0 %v1677_v5 }
 0x254   : > { %1679 = vmatprep.subr.bf16.mxu0 %v1885_v23 }
 0x257   : > { %1681 = vmatpush3.bf16.msra.mxu0 %v1680_v8 }
 0x258   : > { %1682 = vmatprep.subr.bf16.mxu0 %v1885_v23 }
 0x25b   : > { %1684 = vmatpush3.bf16.msra.mxu0 %v1683_v11 }
 0x311   : > { %v1342_v12 = vpop.f32.mrb[6].mxu0  ;;  %v1459_v13 = vpop.f32.mrb[6].mxu1 }
 0x312   : > { %v1343_v14 = vpop.f32.mrb[7].mxu0  ;;  %v993_v17 = vpop.f32.mrb[7].mxu1 }
 0x313   : > { %v1344_v16 = vadd.f32 %v1343_v14, %v1342_v12 }
 0x315   : > { %v919_v18 = vadd.f32 %v1344_v16, %v1207_v15  ;;  %v1345_v19 = vpop.f32.mrb[8].mxu0 }
 0x316   : > { %v1346_v20 = vpop.f32.mrb[9].mxu0 }
 0x317   : > { %v994_v21 = vadd.f32 %v993_v17, %v919_v18  ;;  %v1347_v22 = vadd.f32 %v1346_v20, %v1345_v19 }
 0x319   : > { %v924_v23 = vadd.f32 %v1347_v22, %v1207_v15  ;;  %v1002_v24 = vmax.f32 %v994_v21, 0.0 }
 0x31b   : > { %v999_v25 = vadd.f32 %v1459_v13, %v924_v23 }
 0x31d   : > { %v1003_v26 = vmax.f32 %v999_v25, 0.0 }
 0x31f   : > { %v1004_v27 = vadd.f32 %v1003_v26, %v1002_v24 }
 0x321   : > { %v1005_v28 = vrot.slane %v1004_v27, 4 }
 0x323   : > { %v1006_v29 = vadd.f32 %v1005_v28, %v1004_v27 }
 0x325   : > { %v1007_v30 = vrot.slane %v1006_v29, 2 }
 0x327   : > { %v1008_v31 = vadd.f32 %v1007_v30, %v1006_v29 }
 0x329   : > { %v1009_v32 = vrot.slane %v1008_v31, 1 }
 0x32b   : > { %v1010_v33 = vadd.f32 %v1009_v32, %v1008_v31 }
 0x32d   : > { %v1012_v34 = vmul.f32 0.0625, %v1010_v33 }
 0x32f   : > { %1493 = vmatmul.mubr.f32.vlgmr.msra.gmra.mrb[10].mxu0 %v1012_v34 }
 0x402   : > { %v1096_v36 = vpop.f32.mrb[10].mxu0 }
 0x403   : > { %v1097_v37 = vadd.f32 %v1096_v36, %v1029_v35  ;;  %v1494_v38 = vpop.f32.mrb[11].mxu0 }
 0x405   : > { %1101 = vst.msk [vmem:[%s354_s29] sm:$0x1] %vm1100_vm5, %v1097_v37 }
 0x406   : > { %1820 = shalt.err (!%p1817_p11)
}
 0x407   : > { %s1821_s18 = scalar_lea.hbm %s2157_s22, 16  ;;  %s1825_s26 = scalar_lea.hbm %s2208_s9, 32 }
 0x408   : > { %p1822_p13 = scmp.ne.s32.totalorder %s2157_s22, %s1821_s18  ;;  %p1826_p6 = scmp.lt.u32.totalorder %s2157_s22, %s2208_s9 }
 0x409   : > { %p1827_p9 = scmp.lt.u32.totalorder %s1825_s26, %s1821_s18  ;;  %p1829_p12 = scmp.lt.u32.totalorder %s1821_s18, %s2157_s22 }
 0x40a   : > { %p1823_p5 = pnand %p1822_p13, %p2229_p1 }
 0x40b   : > { %p1828_p10 = por %p1827_p9, %p1826_p6 }
 0x40c   : > { %p1824_p0 = pneg %p1823_p5 }
 0x40d   : > { %p1830_p2 = por %p1829_p12, %p1828_p10 }
 0x40f   : > { %p1831_p3 = pnand %p1830_p2, %p1824_p0 }
 0x411   : > { %1834 = shalt.err (!%p1831_p3)
}
 0x412   : > { %1693 = dma.vmem_to_hbm [thread:$0]  (%p2229_p1), %s2159_s14, 16, %s2157_s22, %s1103_s25  }
 0x413 PF: > { %p1710_p4 = scmp.ge.s32.totalorder %s1877_s12, 2  ;;  %s1127_s29 = sand.u32 1, %s1865_s30  }
 0x414   : > { %p2230_p7 = scmp.ne.s32.totalorder %s2219_s20, 0  ;;  %s1128_s16 = scalar_lea.sflag [#allocation6], %s1127_s29 }
 0x416   : > { %p1703_p8 = pnand %p1710_p4, %p2230_p7 }
 0x418   : > { %1860 = dma.done.wait (!%p1703_p8), %s1128_s16, 16  }
 0x419   : > { %1862 = vsyncadd (!%p1703_p8), %s1128_s16, 4294967280  ;;  %s2231_s12 = sld [smem:[#allocation14_spill]]  ;;  %s2232_s17 = sld [smem:[#allocation13_spill]] }
 0x41a   : > { %s2233_s11 = sld [smem:[#allocation15_spill]]  ;;  %s2234_s30 = smov %s1869_s10 }
 0x41f   : > { %p21_p11 = scmp.ge.s32.totalorder %s2231_s12, 4   ;;  %s2235_s10 = smov %s2232_s17 }
 0x421   :  { %23 = sbr.rel (!%p21_p11) target bundleno = 5 (0x5), region = 100 }
 0x428   :  { %1132 = vsyncpa [#allocation5], 1 }
 0x429   :  { %1134 = vsyncpa [#allocation5 + $0x1], 1 }
 0x42a   :  { %1135 = vsyncpa [#allocation8], 1 }
 0x42b   :  { %1136 = vsyncpa [#allocation6], 1 }
 0x42c   :  { %1138 = vsyncpa [#allocation6 + $0x1], 1 }

</bundles_post_ra>
